<compile_context>
chip_gen: v7x
topology: tpu7x:2x2x1
jax: 0.10.0
libtpu: 0.0.40
codegen_flags: <defaults>
</compile_context>

<pallas_src>
import functools

import jax
import jax.numpy as jnp
from jax.experimental import pallas as pl
from jax.experimental.pallas import tpu as pltpu

LANE = 128
SUBL = 8
NCORES = 2  # split of the reduction across TensorCores (v7x); serial elsewhere


def _bce_kernel(x_ref, t_ref, o_ref, *, n_valid, block_rows, real_blocks,
                steps_per_core):
    c = pl.program_id(0)
    i = pl.program_id(1)

    # Output block is resident across the (arbitrary) step axis -> accumulator.
    @pl.when(i == 0)
    def _init():
        o_ref[...] = jnp.zeros_like(o_ref)

    # Compute in f32 regardless of HBM dtype (v5e has no bf16 VPU/EUP).
    x = x_ref[...].astype(jnp.float32)
    t = t_ref[...].astype(jnp.float32)
    # VPU: max/mul/sub/abs; EUP: exp/log1p (separate VLIW slot, effectively free
    # at HBM roofline).
    elem = jnp.maximum(x, 0.0) - x * t + jnp.log1p(jnp.exp(-jnp.abs(x)))

    gblock = c * steps_per_core + i  # logical (unclamped) block index
    groups = block_rows // SUBL

    def fold(v):
        # (block_rows,128) -> (groups,8,128) is the native sublane tiling, so
        # the reshape is free; sum(axis=0) is plain vreg adds on the VPU.
        return v.reshape(groups, SUBL, LANE).sum(axis=0)

    # Interior blocks: every element is valid, skip mask math entirely.
    @pl.when(gblock < real_blocks - 1)
    def _interior():
        o_ref[...] += fold(elem)

    # Last real block (possibly partial / zero-padded) and any over-split
    # duplicate blocks: mask by global element index.  (int32 indexing: fine
    # for n_valid < 2^31 elements.)
    @pl.when(gblock >= real_blocks - 1)
    def _edge():
        row_ids = jax.lax.broadcasted_iota(jnp.int32, (block_rows, LANE), 0)
        lane_ids = jax.lax.broadcasted_iota(jnp.int32, (block_rows, LANE), 1)
        gidx = (gblock * block_rows + row_ids) * LANE + lane_ids
        o_ref[...] += fold(jnp.where(gidx < n_valid, elem, 0.0))


def bce_with_logits_loss(x, target, *, row_tile=1024):
    """Mean-reduced BCEWithLogitsLoss over arbitrarily shaped x/target."""
    assert x.shape == target.shape
    n_valid = x.size
    if n_valid == 0:
        # PyTorch's mean reduction over an empty tensor is NaN.
        return jnp.float32(jnp.nan)

    # Keep native dtype in HBM (no wrapper-side upcast).
    xf = x.reshape(-1)
    tf = target.reshape(-1)

    # View as a lane-dense (rows, 128) slab with rows % 8 == 0.  Only pad when
    # the flat size is not already a multiple of 8*128 (the common aligned
    # NCHW case needs no copy at all); padded elements are masked in-kernel.
    chunk = SUBL * LANE
    rem = n_valid % chunk
    if rem:
        pad = chunk - rem
        xf = jnp.pad(xf, (0, pad))
        tf = jnp.pad(tf, (0, pad))
    rows = xf.shape[0] // LANE
    x2 = xf.reshape(rows, LANE)
    t2 = tf.reshape(rows, LANE)

    block_rows = min(row_tile, rows)            # both are multiples of 8
    real_blocks = pl.cdiv(rows, block_rows)
    steps_per_core = pl.cdiv(real_blocks, NCORES)

    def in_map(c, i):
        # Clamp over-split steps to the last real block: the DMA stays in
        # bounds and the in-kernel iota mask zeroes their contribution.
        return (jnp.minimum(c * steps_per_core + i, real_blocks - 1), 0)

    in_spec = pl.BlockSpec((block_rows, LANE), in_map)

    out = pl.pallas_call(
        functools.partial(
            _bce_kernel,
            n_valid=n_valid,
            block_rows=block_rows,
            real_blocks=real_blocks,
            steps_per_core=steps_per_core,
        ),
        out_shape=jax.ShapeDtypeStruct((NCORES * SUBL, LANE), jnp.float32),
        grid_spec=pltpu.PrefetchScalarGridSpec(
            num_scalar_prefetch=0,
            grid=(NCORES, steps_per_core),
            in_specs=[in_spec, in_spec],
            out_specs=pl.BlockSpec((SUBL, LANE), lambda c, i: (c, 0)),
        ),
        compiler_params=pltpu.CompilerParams(
            dimension_semantics=("parallel", "arbitrary"),
        ),
    )(x2, t2)

    # Tiny final cross-lane reduce (2*8 x 128 partials) + mean.
    return jnp.sum(out) / jnp.float32(n_valid)


def _reference(x, target):
    x = x.astype(jnp.float32)
    t = target.astype(jnp.float32)
    elem = jnp.maximum(x, 0.0) - x * t + jnp.log1p(jnp.exp(-jnp.abs(x)))
    return jnp.mean(elem)


if __name__ == "__main__":
    key = jax.random.PRNGKey(0)
    kx, kt = jax.random.split(key)

    # Small NCHW-shaped logits and {0,1} targets (aligned size, f32 path).
    shape = (2, 4, 16, 16)
    x = jax.random.normal(kx, shape, dtype=jnp.float32) * 2.0
    target = jax.random.bernoulli(kt, p=0.5, shape=shape).astype(jnp.float32)

    loss = jax.block_until_ready(bce_with_logits_loss(x, target))
    ref = jax.block_until_ready(_reference(x, target))
    assert jnp.allclose(loss, ref, rtol=1e-5, atol=1e-6), (loss, ref)

    # Unaligned size + bf16 inputs exercise the masked tail and the
    # native-dtype (narrow HBM) path.
    k2x, k2t = jax.random.split(jax.random.PRNGKey(1))
    shape2 = (3, 5, 7, 11)
    x2 = (jax.random.normal(k2x, shape2, dtype=jnp.float32) * 2.0).astype(
        jnp.bfloat16)
    t2 = jax.random.bernoulli(k2t, p=0.5, shape=shape2).astype(jnp.bfloat16)
    loss2 = jax.block_until_ready(bce_with_logits_loss(x2, t2))
    ref2 = jax.block_until_ready(_reference(x2, t2))
    assert jnp.allclose(loss2, ref2, rtol=1e-5, atol=1e-6), (loss2, ref2)

    print("KERNEL_OK")
</pallas_src>

<mosaic_0001>
module attributes {stable_mosaic.version = 11 : i64} {
  func.func @_bce_kernel(%arg0: i32, %arg1: i32, %arg2: memref<16x128xf32, #tpu.memory_space<vmem>>, %arg3: memref<16x128xf32, #tpu.memory_space<vmem>>, %arg4: memref<8x128xf32, #tpu.memory_space<vmem>>) attributes {dimension_semantics = [#tpu.dimension_semantics<parallel>, #tpu.dimension_semantics<arbitrary>], iteration_bounds = array<i64: 2, 1>, scalar_prefetch = 0 : i64, scratch_operands = 0 : i64, tpu.core_type = #tpu.core_type<tc>, window_params = [{transform_indices = @transform_0, window_bounds = array<i64: 16, 128>}, {transform_indices = @transform_1, window_bounds = array<i64: 16, 128>}, {transform_indices = @transform_2, window_bounds = array<i64: 8, 128>}]} {
    %c0_i32 = arith.constant 0 : i32
    %0 = arith.cmpi eq, %arg1, %c0_i32 : i32
    %1 = arith.extui %0 : i1 to i32
    %c0_i32_0 = arith.constant 0 : i32
    %2 = arith.cmpi ne, %1, %c0_i32_0 : i32
    scf.if %2 {
      %cst_9 = arith.constant 0.000000e+00 : f32
      %23 = vector.broadcast %cst_9 : f32 to vector<8x128xf32>
      %c0_10 = arith.constant 0 : index
      %c0_11 = arith.constant 0 : index
      %24 = vector.load %arg4[%c0_10, %c0_11] : memref<8x128xf32, #tpu.memory_space<vmem>>, vector<8x128xf32>
      tpu.vector_store %arg4[%c0_10, %c0_11], %23 {strides = array<i32>} : memref<8x128xf32, #tpu.memory_space<vmem>>, vector<8x128xf32>,
    } else {
    }
    %c0 = arith.constant 0 : index
    %c0_1 = arith.constant 0 : index
    %3 = vector.load %arg2[%c0, %c0_1] : memref<16x128xf32, #tpu.memory_space<vmem>>, vector<16x128xf32>
    %c0_2 = arith.constant 0 : index
    %c0_3 = arith.constant 0 : index
    %4 = vector.load %arg3[%c0_2, %c0_3] : memref<16x128xf32, #tpu.memory_space<vmem>>, vector<16x128xf32>
    %cst = arith.constant 0.000000e+00 : f32
    %5 = vector.broadcast %cst : f32 to vector<16x128xf32>
    %6 = arith.maximumf %3, %5 : vector<16x128xf32>
    %7 = arith.mulf %3, %4 : vector<16x128xf32>
    %8 = arith.subf %6, %7 : vector<16x128xf32>
    %9 = math.absf %3 : vector<16x128xf32>
    %cst_4 = arith.constant 0.000000e+00 : f32
    %10 = vector.broadcast %cst_4 : f32 to vector<16x128xf32>
    %11 = arith.subf %10, %9 : vector<16x128xf32>
    %12 = math.exp %11 : vector<16x128xf32>
    %13 = math.log1p %12 : vector<16x128xf32>
    %14 = arith.addf %8, %13 : vector<16x128xf32>
    %c1_i32 = arith.constant 1 : i32
    %15 = arith.muli %arg0, %c1_i32 : i32
    %16 = arith.addi %15, %arg1 : i32
    %c0_i32_5 = arith.constant 0 : i32
    %17 = arith.cmpi slt, %16, %c0_i32_5 : i32
    %18 = arith.extui %17 : i1 to i32
    %c0_i32_6 = arith.constant 0 : i32
    %19 = arith.cmpi ne, %18, %c0_i32_6 : i32
    scf.if %19 {
      %c0_9 = arith.constant 0 : index
      %c0_10 = arith.constant 0 : index
      %23 = vector.load %arg4[%c0_9, %c0_10] : memref<8x128xf32, #tpu.memory_space<vmem>>, vector<8x128xf32>
      %24 = vector.shape_cast %14 : vector<16x128xf32> to vector<2x8x128xf32>
      %cst_11 = arith.constant dense<0.000000e+00> : vector<8x128xf32>
      %25 = vector.multi_reduction <add>, %24, %cst_11 [0] : vector<2x8x128xf32> to vector<8x128xf32>
      %26 = arith.addf %23, %25 : vector<8x128xf32>
      %c0_12 = arith.constant 0 : index
      %c0_13 = arith.constant 0 : index
      %27 = vector.load %arg4[%c0_12, %c0_13] : memref<8x128xf32, #tpu.memory_space<vmem>>, vector<8x128xf32>
      tpu.vector_store %arg4[%c0_12, %c0_13], %26 {strides = array<i32>} : memref<8x128xf32, #tpu.memory_space<vmem>>, vector<8x128xf32>,
    } else {
    }
    %c0_i32_7 = arith.constant 0 : i32
    %20 = arith.cmpi sge, %16, %c0_i32_7 : i32
    %21 = arith.extui %20 : i1 to i32
    %c0_i32_8 = arith.constant 0 : i32
    %22 = arith.cmpi ne, %21, %c0_i32_8 : i32
    scf.if %22 {
      %23 = tpu.iota {dimensions = array<i32: 0>} : vector<16x128xi32>
      %24 = tpu.iota {dimensions = array<i32: 1>} : vector<16x128xi32>
      %c16_i32 = arith.constant 16 : i32
      %25 = arith.muli %16, %c16_i32 : i32
      %26 = vector.broadcast %25 : i32 to vector<16x128xi32>
      %27 = arith.addi %26, %23 : vector<16x128xi32>
      %c128_i32 = arith.constant 128 : i32
      %28 = vector.broadcast %c128_i32 : i32 to vector<16x128xi32>
      %29 = arith.muli %27, %28 : vector<16x128xi32>
      %30 = arith.addi %29, %24 : vector<16x128xi32>
      %c0_9 = arith.constant 0 : index
      %c0_10 = arith.constant 0 : index
      %31 = vector.load %arg4[%c0_9, %c0_10] : memref<8x128xf32, #tpu.memory_space<vmem>>, vector<8x128xf32>
      %c2048_i32 = arith.constant 2048 : i32
      %32 = vector.broadcast %c2048_i32 : i32 to vector<16x128xi32>
      %33 = arith.cmpi slt, %30, %32 : vector<16x128xi32>
      %cst_11 = arith.constant 0.000000e+00 : f32
      %34 = vector.broadcast %cst_11 : f32 to vector<16x128xf32>
      %35 = arith.select %33, %14, %34 : vector<16x128xi1>, vector<16x128xf32>
      %36 = vector.shape_cast %35 : vector<16x128xf32> to vector<2x8x128xf32>
      %cst_12 = arith.constant dense<0.000000e+00> : vector<8x128xf32>
      %37 = vector.multi_reduction <add>, %36, %cst_12 [0] : vector<2x8x128xf32> to vector<8x128xf32>
      %38 = arith.addf %31, %37 : vector<8x128xf32>
      %c0_13 = arith.constant 0 : index
      %c0_14 = arith.constant 0 : index
      %39 = vector.load %arg4[%c0_13, %c0_14] : memref<8x128xf32, #tpu.memory_space<vmem>>, vector<8x128xf32>
      tpu.vector_store %arg4[%c0_13, %c0_14], %38 {strides = array<i32>} : memref<8x128xf32, #tpu.memory_space<vmem>>, vector<8x128xf32>,
    } else {
    }
    return
  }
  func.func @transform_0(%arg0: i32, %arg1: i32) -> (i32, i32) {
    %c1_i32 = arith.constant 1 : i32
    %0 = arith.muli %arg0, %c1_i32 : i32
    %1 = arith.addi %0, %arg1 : i32
    %c0_i32 = arith.constant 0 : i32
    %2 = arith.minsi %1, %c0_i32 : i32
    %c0_i32_0 = arith.constant 0 : i32
    %c0_i32_1 = arith.constant 0 : i32
    return %2, %c0_i32_0 : i32, i32
  }
  func.func @transform_1(%arg0: i32, %arg1: i32) -> (i32, i32) {
    %c1_i32 = arith.constant 1 : i32
    %0 = arith.muli %arg0, %c1_i32 : i32
    %1 = arith.addi %0, %arg1 : i32
    %c0_i32 = arith.constant 0 : i32
    %2 = arith.minsi %1, %c0_i32 : i32
    %c0_i32_0 = arith.constant 0 : i32
    %c0_i32_1 = arith.constant 0 : i32
    return %2, %c0_i32_0 : i32, i32
  }
  func.func @transform_2(%arg0: i32, %arg1: i32) -> (i32, i32) {
    %c0_i32 = arith.constant 0 : i32
    %c0_i32_0 = arith.constant 0 : i32
    return %arg0, %c0_i32 : i32, i32
  }
}

</mosaic_0001>

<bundles_post_ra>
// kernel: tpu_custom_call.1
= control target key start
LH: loop header
LB: loop body
LE: loop exit
PB: predicated region body
PF: predicated region fallthrough
CT: control target
= control target key end

     0   :  { %7 = vsyncpa [#allocation3], 0  ;;  %s959_s0 = inlined_call_operand.hbm [shape: f32[16,128], index: 0, kind: input, shape index: {}]   ;;  %s960_s1 = inlined_call_operand.hbm [shape: f32[16,128], index: 1, kind: input, shape index: {}]   ;;  %s961_s2 = inlined_call_operand.hbm [shape: f32[16,128], index: 2, kind: output, shape index: {}]  }
   0x1   :  { %9 = vsyncpa [#allocation3 + $0x1], 0 }
   0x2   :  { %10 = vsyncpa [#allocation6], 0 }
   0x3   :  { %12 = vsyncpa [#allocation6 + $0x1], 0 }
   0x4   :  { %13 = vsyncpa [#allocation4], 0 }
   0x5   :  { %15 = vsyncpa [#allocation4 + $0x1], 0  ;;  %s747_s9 = smov 0   ;;  %s749_s10 = smov 0  }
   0x6   :  { %s751_s11 = smov 0   ;;  %s753_s12 = smov 0  }
   0x7   :  { %s755_s13 = smov 0   ;;  %s757_s14 = smov 0  }
   0x8   :  { %s759_s15 = smov 0   ;;  %s761_s16 = smov 0  }
   0x9 LB: > { %s432_s17 = sadd.s32 4294967295, %s724_s16   ;;  %s433_s18 = sadd.s32 4294967294, %s724_s16   ;;  %s724_s16 = sphi %s761_s16, %s21_s16   ;;  %s720_s15 = sphi %s759_s15, %s980_s15   ;;  %s716_s14 = sphi %s757_s14, %s979_s14   ;;  %s712_s13 = sphi %s755_s13, %s949_s13   ;;  %s708_s12 = sphi %s753_s12, %s978_s12   ;;  %s704_s11 = sphi %s751_s11, %s977_s11   ;;  %s700_s10 = sphi %s749_s10, %s976_s10   ;;  %s696_s9 = sphi %s747_s9, %s975_s9  }
   0xa   : > { %s33_s19 = sadd.s32 1, %s720_s15  ;;  %p693_p1 = scmp.ne.s32.totalorder %s712_s13, 0 }
   0xb   : > { %p35_p0 = scmp.ge.s32.totalorder %s33_s19, 2  ;;  %p54_p2 = scmp.eq.s32.totalorder %s724_s16, 0 }
   0xc   : > { %p59_p3 = scmp.ne.s32.totalorder %s712_s13, %s708_s12  ;;  %p60_p5 = scmp.eq.s32.totalorder %s432_s17, 0 }
   0xd   : > { %s982_s19 = smov (%p35_p0, %s33_s19), 0  ;;  %p793_p4 = por %p693_p1, %p54_p2 }
   0xe   : > { %p797_p6 = por %p60_p5, %p59_p3  ;;  %s101_s22 = ssub.s32 %s720_s15, %s982_s19 }
   0xf   : > { %p102_p7 = scmp.eq.s32.totalorder %s101_s22, 0  ;;  %s104_s23 = sadd.s32 1, %s704_s11 }
  0x10   : > { %s965_s21 = scalar_select %p797_p6, 1, 0 }
  0x11   : > { %s805_s24 = scalar_select %p102_p7, %s704_s11, %s104_s23  }
  0x12   : > { %p114_p8 = scmp.ne.s32.totalorder %s704_s11, %s700_s10  ;;  %p115_p9 = scmp.eq.s32.totalorder %s432_s17, 1 }
  0x13   : > { %p120_p10 = scmp.ne.s32.totalorder %s700_s10, %s696_s9  ;;  %p121_p11 = scmp.eq.s32.totalorder %s433_s18, 1 }
  0x14   : > { %p811_p12 = por %p115_p9, %p114_p8  ;;  %p472_p1 = scmp.lt.s32.totalorder %s724_s16, 2 }
  0x15   : > { %p816_p0 = por %p121_p11, %p120_p10  ;;  %s726_s27 = smov [#allocation2]  }
  0x16   : > { %s966_s25 = scalar_select %p811_p12, 1, 0 }
  0x17   : > { %s967_s26 = scalar_select %p816_p0, 1, 0 }
  0x18   : > { %s155_s28 = sshll.u32 %s726_s27, 4  ;;  %p823_p2 = pnand %p472_p1, %p793_p4  ;;  %s156_s28 = int_to_ptr.vmem [resolvable:$true] %s155_s28 }
  0x19   : > { %s557_s4 = scalar_lea.hbm %s959_s0, 256 }
  0x1a   : > { %p558_p3 = scmp.ne.s32.totalorder %s959_s0, %s557_s4  ;;  %p559_p5 = pneg %p823_p2 }
  0x1b   : > { %p564_p8 = scmp.lt.u32.totalorder %s557_s4, %s557_s4  ;;  %p566_p9 = scmp.lt.u32.totalorder %s557_s4, %s959_s0 }
  0x1c   : > { %p560_p7 = pnand %p559_p5, %p558_p3 }
  0x1d   : > { %p567_p10 = por %p566_p9, %p564_p8 }
  0x1e   : > { %p561_p4 = pneg %p560_p7 }
  0x20   : > { %p568_p11 = pnand %p567_p10, %p561_p4 }
  0x22   : > { %571 = shalt.err (!%p568_p11)
}
  0x23   : > { %s572_s12 = scalar_lea.vmem %s156_s28, 256  ;;  %s579_s17 = scalar_lea.vmem %s156_s28, 512 }
  0x24   : > { %p573_p1 = scmp.ne.s32.totalorder %s156_s28, %s572_s12  ;;  %p580_p12 = scmp.lt.s32.totalorder %s156_s28, %s156_s28 }
  0x25   : > { %p581_p6 = scmp.lt.s32.totalorder %s579_s17, %s572_s12 }
  0x26   : > { %p575_p13 = pnand %p573_p1, %p559_p5 }
  0x27   : > { %p582_p3 = por %p581_p6, %p580_p12 }
  0x28   : > { %p576_p0 = pneg %p575_p13 }
  0x2a   : > { %p583_p7 = pnand %p582_p3, %p576_p0 }
  0x2c   : > { %586 = shalt.err (!%p583_p7)
}
  0x2d   : > { %s727_s18 = smov 128   ;;  %s728_s20 = smov 8  }
  0x2e   : > { %464 = dma.hbm_to_vmem [thread:$0]  (!%p823_p2), %s959_s0, 256, %s156_s28, [#allocation3], %s727_s18, %s727_s18, %s728_s20  }
  0x2f   : > { %p442_p13 = scmp.ge.s32.totalorder %s724_s16, 1  ;;  %p187_p4 = scmp.lt.s32.totalorder %s724_s16, 3 }
  0x30   : > { %s729_s30 = smov [#allocation5]   ;;  %s587_s6 = scalar_lea.hbm %s960_s1, 256 }
  0x31   : > { %p854_p8 = pnand %p442_p13, %p187_p4  ;;  %s179_s3 = sshll.u32 %s729_s30, 4  ;;  %s180_s3 = int_to_ptr.vmem [resolvable:$true] %s179_s3 }
  0x32   : > { %p588_p6 = scmp.ne.s32.totalorder %s960_s1, %s587_s6  ;;  %p594_p9 = scmp.lt.u32.totalorder %s587_s6, %s587_s6 }
  0x33   : > { %s969_s27 = scalar_select %p854_p8, 1, 0 }
  0x34   : > { %p590_p12 = pnand %p588_p6, %p559_p5  ;;  %p596_p10 = scmp.lt.u32.totalorder %s587_s6, %s960_s1 }
  0x36   : > { %p591_p0 = pneg %p590_p12  ;;  %p597_p11 = por %p596_p10, %p594_p9 }
  0x38   : > { %p598_p1 = pnand %p597_p11, %p591_p0 }
  0x3a   : > { %601 = shalt.err (!%p598_p1)
}
  0x3b   : > { %s602_s17 = scalar_lea.vmem %s180_s3, 256  ;;  %s609_s22 = scalar_lea.vmem %s180_s3, 512 }
  0x3c   : > { %p603_p3 = scmp.ne.s32.totalorder %s180_s3, %s602_s17  ;;  %p610_p4 = scmp.lt.s32.totalorder %s180_s3, %s180_s3 }
  0x3d   : > { %p611_p8 = scmp.lt.s32.totalorder %s609_s22, %s602_s17 }
  0x3e   : > { %p605_p7 = pnand %p603_p3, %p559_p5 }
  0x3f   : > { %p612_p6 = por %p611_p8, %p610_p4 }
  0x40   : > { %p606_p13 = pneg %p605_p7 }
  0x42   : > { %p613_p12 = pnand %p612_p6, %p606_p13 }
  0x44   : > { %616 = shalt.err (!%p613_p12)
}
  0x45   : > { %467 = dma.hbm_to_vmem [thread:$0]  (!%p823_p2), %s960_s1, 256, %s180_s3, [#allocation6], %s727_s18, %s727_s18, %s728_s20  }
  0x46   : > { %p970_p0 = scmp.ne.s32.totalorder %s969_s27, 0 }
  0x47   : > { %s193_s4 = sand.u32 (!%p970_p0), 1, %s712_s13   ;;  %p971_p5 = scmp.ne.s32.totalorder (!%p970_p0), %s965_s21, 0 }
  0x48   : > { %191 = sbr.rel (%p970_p0) target bundleno = 169 (0xa9), region = 28  ;;  %s443_s5 = sshll.u32 (!%p970_p0), %s193_s4, 4 }
  0x49   : > { %s194_s6 = scalar_lea.sflag (!%p970_p0), [#allocation3], %s193_s4  ;;  %s197_s7 = scalar_lea.vmem (!%p970_p0), [#allocation2], %s443_s5 }
  0x4f   : > { %682 = dma.done.wait (%p971_p5), %s194_s6, 256  }
  0x50   : > { %684 = vsyncadd (%p971_p5), %s194_s6, 4294967040  ;;  %s203_s29 = scalar_lea.sflag [#allocation6], %s193_s4  ;;  %s206_s8 = scalar_lea.vmem [#allocation5], %s443_s5 }
  0x51   : > { %686 = dma.done.wait (%p971_p5), %s203_s29, 256  }
  0x52   : > { %688 = vsyncadd (%p971_p5), %s203_s29, 4294967040  ;;  %s229_s18 = sand.u32 1, %s700_s10   ;;  %v730_v0 = vmov 0.0   ;;  %v245_v1 = vld [vmem:[%s197_s7] sm:$0xff]  ;;  %v246_v2 = vld [vmem:[%s197_s7 + $0x8] sm:$0xff]  ;;  %p446_p2 = scmp.ge.s32.totalorder %s716_s14, 0 }
  0x53   : > { %s445_s20 = sshll.u32 %s229_s18, 3  ;;  %v255_v3 = vand.u32 2147483647, %v245_v1  ;;  %v256_v4 = vand.u32 2147483647, %v246_v2  ;;  %v247_v15 = vld [vmem:[%s206_s8] sm:$0xff] }
  0x54   : > { %s895_s27 = scalar_lea.vmem [#allocation7], %s445_s20  ;;  %v248_v16 = vld [vmem:[%s206_s8 + $0x8] sm:$0xff]  ;;  %v249_v18 = vmax.f32 %v245_v1, 0.0  ;;  %v251_v19 = vmul.f32 %v247_v15, %v245_v1  ;;  %v250_v22 = vmax.f32 %v246_v2, 0.0 }
  0x55   : > { %244 = vst [vmem:[%s895_s27] sm:$0xff] %v730_v0  ;;  %v257_v5 = vsub.f32 0.0, %v255_v3  ;;  %v258_v6 = vsub.f32 0.0, %v256_v4  ;;  %v252_v23 = vmul.f32 %v248_v16, %v246_v2 }
  0x56   : > { %v253_v27 = vsub.f32 %v249_v18, %v251_v19 }
  0x57   : > { %v259_v7 = vmul.f32 1.442695, %v257_v5  ;;  %v261_v8 = vmul.f32 1.442695, %v258_v6  ;;  %v254_v30 = vsub.f32 %v250_v22, %v252_v23 }
  0x59   : > { %549 = vpow2.f32 %v259_v7 }
  0x5a   : > { %551 = vpow2.f32 %v261_v8 }
  0x5c   : > { %v288_v37 = vld [vmem:[%s895_s27] sm:$0xff] (!%p446_p2) }
  0x63   : > { %v550_v9 = vpop.eup %549 }
  0x64   : > { %v552_v10 = vpop.eup %551  ;;  %v263_v11 = vadd.f32 1.0, %v550_v9  ;;  %v266_v13 = vmul.f32 -0.5, %v550_v9  ;;  %v269_v20 = vand.u32 2147483647, %v550_v9 }
  0x65   : > { %v272_v12 = vadd.f32 1.0, %v552_v10  ;;  %v275_v14 = vmul.f32 -0.5, %v552_v10  ;;  %v278_v24 = vand.u32 2147483647, %v552_v10 }
  0x66   : > { %553 = vlog2.f32 %v263_v11  ;;  %v267_v17 = vadd.f32 1.0, %v266_v13  ;;  %vm270_vm0 = vcmp.lt.f32.partialorder %v269_v20, 0.0004427343 }
  0x67   : > { %555 = vlog2.f32 %v272_v12  ;;  %v276_v21 = vadd.f32 1.0, %v275_v14  ;;  %vm279_vm1 = vcmp.lt.f32.partialorder %v278_v24, 0.0004427343 }
  0x68   : > { %v268_v25 = vmul.f32 %v550_v9, %v267_v17 }
  0x69   : > { %v277_v28 = vmul.f32 %v552_v10, %v276_v21 }
  0x6f   : > { %287 = sbr.rel (%p446_p2) target bundleno = 124 (0x7c), region = 44 }
  0x70   : > { %v554_v26 = vpop.eup %553 }
  0x71   : > { %v556_v29 = vpop.eup %555  ;;  %v265_v31 = vmul.f32 0.6931472, %v554_v26 }
  0x72   : > { %v274_v32 = vmul.f32 0.6931472, %v556_v29 }
  0x73   : > { %v271_v33 = vsel %vm270_vm0, %v268_v25, %v265_v31 }
  0x74   : > { %v280_v34 = vsel %vm279_vm1, %v277_v28, %v274_v32  ;;  %v281_v35 = vadd.f32 %v271_v33, %v253_v27 }
  0x75   : > { %v282_v36 = vadd.f32 %v280_v34, %v254_v30 }
  0x77   : > { %v289_v38 = vadd.f32 %v282_v36, %v281_v35 }
  0x79   : > { %v290_v39 = vadd.f32 %v289_v38, %v288_v37 }
  0x7b   : > { %291 = vst [vmem:[%s895_s27] sm:$0xff] %v290_v39 }
  0x7c PF: > { %p447_p8 = scmp.lt.s32.totalorder %s716_s14, 0 }
  0x7d   : > { %v296_v40 = vlaneseq (!%p447_p8)  ;;  %s448_s21 = sshll.u32 (!%p447_p8), %s716_s14, 4 }
  0x7e   : > { %295 = sbr.rel (%p447_p8) target bundleno = 144 (0x90), region = 48  ;;  %v302_v41 = vstv (!%p447_p8), %s448_s21 }
  0x7f   : > { %v297_v42 = vshrl.u32 (!%p447_p8), %v296_v40, 7  ;;  %v300_v44 = vand.u32 (!%p447_p8), 127, %v296_v40 }
  0x81   : > { %v298_v43 = vadd.s32 (!%p447_p8), 8, %v297_v42  ;;  %v303_v45 = vadd.s32 (!%p447_p8), %v302_v41, %v297_v42 }
  0x82   : > { %v309_v52 = vld [vmem:[%s895_s27] sm:$0xff] (!%p447_p8) }
  0x83   : > { %v304_v46 = vadd.s32 (!%p447_p8), %v302_v41, %v298_v43  ;;  %v305_v47 = vmul.u32 (!%p447_p8), 128, %v303_v45 }
  0x85   : > { %v306_v48 = vmul.u32 128, %v304_v46  ;;  %v307_v49 = vadd.s32 %v305_v47, %v300_v44 }
  0x87   : > { %v308_v50 = vadd.s32 %v306_v48, %v300_v44  ;;  %vm310_vm2 = vcmp.lt.s32.totalorder %v307_v49, 2048 }
  0x88   : > { %v312_v51 = vsel %vm310_vm2, %v281_v35, 0.0 }
  0x89   : > { %vm311_vm3 = vcmp.lt.s32.totalorder %v308_v50, 2048 }
  0x8a   : > { %v313_v53 = vsel %vm311_vm3, %v282_v36, 0.0 }
  0x8b   : > { %v314_v54 = vadd.f32 %v313_v53, %v312_v51 }
  0x8d   : > { %v315_v55 = vadd.f32 %v314_v54, %v309_v52 }
  0x8f   : > { %316 = vst [vmem:[%s895_s27] sm:$0xff] %v315_v55 }
  0x90 PF: > { %s450_s3 = sshll.u32 %s716_s14, 7  ;;  %s331_s22 = sshll.u32 %s895_s27, 4  ;;  %s332_s22 = int_to_ptr.vmem [resolvable:$true] %s331_s22 }
  0x91   : > { %s909_s17 = scalar_lea.hbm %s961_s2, %s450_s3  ;;  %s318_s23 = scalar_lea.sflag [#allocation4], %s229_s18 }
  0x92   : > { %s617_s30 = scalar_lea.vmem %s332_s22, 128  ;;  %p972_p10 = scmp.ne.s32.totalorder %s966_s25, 0 }
  0x93   : > { %p618_p9 = scmp.ne.s32.totalorder %s332_s22, %s617_s30  ;;  %s731_s4 = smov [#allocation7]  }
  0x94   : > { %s621_s5 = sshll.u32 %s731_s4, 4  ;;  %s622_s5 = int_to_ptr.vmem [resolvable:$false] %s621_s5 }
  0x95   : > { %p619_p11 = pnand %p618_p9, %p972_p10  ;;  %s623_s6 = scalar_lea.vmem %s622_s5, 256 }
  0x96   : > { %p624_p3 = scmp.lt.s32.totalorder %s332_s22, %s622_s5  ;;  %p625_p7 = scmp.lt.s32.totalorder %s623_s6, %s617_s30 }
  0x97   : > { %p620_p1 = pneg %p619_p11 }
  0x98   : > { %p626_p13 = por %p625_p7, %p624_p3 }
  0x9a   : > { %p627_p4 = pnand %p626_p13, %p620_p1 }
  0x9c   : > { %630 = shalt.err (!%p627_p4)
}
  0x9d   : > { %s631_s14 = scalar_lea.hbm %s909_s17, 128  ;;  %s635_s8 = scalar_lea.hbm %s961_s2, 256 }
  0x9e   : > { %p632_p6 = scmp.ne.s32.totalorder %s909_s17, %s631_s14  ;;  %p636_p5 = scmp.lt.u32.totalorder %s909_s17, %s961_s2 }
  0x9f   : > { %p637_p2 = scmp.lt.u32.totalorder %s635_s8, %s631_s14  ;;  %p639_p9 = scmp.lt.u32.totalorder %s631_s14, %s909_s17 }
  0xa0   : > { %p633_p12 = pnand %p632_p6, %p972_p10 }
  0xa1   : > { %p638_p8 = por %p637_p2, %p636_p5 }
  0xa2   : > { %p634_p0 = pneg %p633_p12 }
  0xa3   : > { %p640_p11 = por %p639_p9, %p638_p8 }
  0xa5   : > { %p641_p1 = pnand %p640_p11, %p634_p0 }
  0xa7   : > { %644 = shalt.err (!%p641_p1)
}
  0xa8   : > { %459 = dma.vmem_to_hbm [thread:$0]  (%p972_p10), %s332_s22, 128, %s909_s17, %s318_s23  }
  0xa9 PF: > { %s343_s27 = sand.u32 1, %s696_s9   ;;  %p973_p3 = scmp.ne.s32.totalorder %s967_s26, 0 }
  0xaa   : > { %p974_p7 = scmp.ge.s32.totalorder %s724_s16, 2  ;;  %s344_s21 = scalar_lea.sflag [#allocation4], %s343_s27 }
  0xac   : > { %p469_p13 = pnand %p974_p7, %p973_p3 }
  0xae   : > { %690 = dma.done.wait (!%p469_p13), %s344_s21, 128  }
  0xaf   : > { %692 = vsyncadd (!%p469_p13), %s344_s21, 4294967168  ;;  %s21_s16 = sadd.s32 1, %s724_s16   ;;  %s975_s9 = smov %s700_s10 }
  0xb0   : > { %p18_p4 = scmp.ge.s32.totalorder %s21_s16, 4   ;;  %s976_s10 = smov %s704_s11 }
  0xb1   : > { %s977_s11 = smov %s805_s24  ;;  %s978_s12 = smov %s712_s13 }
  0xb2   : > { %s949_s13 = smov 0   ;;  %s979_s14 = smov %s720_s15 }
  0xb3   : > { %s980_s15 = smov %s982_s19  ;;  %20 = sbr.rel (!%p18_p4) target bundleno = 9 (0x9), region = 98 }
  0xba   :  { %349 = vsyncpa [#allocation3], 1 }
  0xbb   :  { %351 = vsyncpa [#allocation3 + $0x1], 1 }
  0xbc   :  { %352 = vsyncpa [#allocation6], 1 }
  0xbd   :  { %354 = vsyncpa [#allocation6 + $0x1], 1 }
  0xbe   :  { %355 = vsyncpa [#allocation4], 1 }
  0xbf   :  { %357 = vsyncpa [#allocation4 + $0x1], 1 }

</bundles_post_ra>
